<compile_context>
chip_gen: v7x
topology: tpu7x:2x2x1
jax: 0.10.0
libtpu: 0.0.40
codegen_flags: <defaults>
</compile_context>

<pallas_src>
import jax
import jax.numpy as jnp
from jax.experimental import pallas as pl
from jax.experimental.pallas import tpu as pltpu


# ---------------------------------------------------------------------------
# Kernels
# ---------------------------------------------------------------------------

def _phase1_kernel(x_ref, w1_ref, hb_ref, h_ref, acc_ref):
    """h = ReLU(sum_k x[:, ktile] @ W1x[ktile, :] + gathered_class_bias).

    acc_ref is an f32 VMEM scratch accumulator; h_ref (possibly bf16) is only
    written once at the final k-step.
    """
    k = pl.program_id(0)

    @pl.when(k == 0)
    def _init():
        acc_ref[...] = hb_ref[...]          # per-class bias = emb @ W1c + b1, gathered per row

    w = w1_ref[...]
    acc_ref[...] += jnp.dot(x_ref[...].astype(w.dtype), w,
                            preferred_element_type=jnp.float32)

    @pl.when(k == pl.num_programs(0) - 1)
    def _finalize():
        h_ref[...] = jnp.maximum(acc_ref[...], 0.0).astype(h_ref.dtype)   # ReLU


def _phase2_kernel(h_ref, w2_ref, b2_ref, o_ref):
    """y[:, jtile] = h @ W2[:, jtile] + b2[jtile]."""
    w = w2_ref[...]
    y = jnp.dot(h_ref[...].astype(w.dtype), w, preferred_element_type=jnp.float32)
    o_ref[...] = (y + b2_ref[...]).astype(o_ref.dtype)


# ---------------------------------------------------------------------------
# Wrapper
# ---------------------------------------------------------------------------

def _pick_tile(D, H, itemsize, budget_bytes=8 * 1024 * 1024):
    """Largest feature-tile TD such that TD divides D, TD % 128 == 0 (or TD == D)
    and the (TD, H) weight tile stays under `budget_bytes` (double-buffered
    streaming then fits the 32 MiB scoped VMEM default with room to spare)."""
    if D * H * itemsize <= budget_bytes:
        return D
    best = None
    t = 128
    while t * H * itemsize <= budget_bytes:
        if D % t == 0:
            best = t
        t += 128
    if best is None:
        # TODO(synk): pad D to the next 128-multiple in the wrapper instead of
        # falling back to a whole-D tile (only hit for pathological D).
        best = D
    return best


def conditional_generator(x, labels, params, *, weight_dtype=None, d_tile=None):
    """Weight-streaming fused MLP generator.  Embedding gather/fold is tiny JAX glue."""
    emb, w1, b1, w2, b2 = (params[k] for k in ("emb", "w1", "b1", "w2", "b2"))
    B, D = x.shape
    H = w1.shape[1]
    out_dtype = x.dtype

    # --- JAX glue: fold embedding branch into a per-class bias table, gather per row.
    w1x = w1[:D]                                   # (D, H) rows multiplied by x in concat([x, c])
    bias_tbl = emb @ w1[D:] + b1                   # (num_classes, H)
    hb = bias_tbl[labels]                          # (B, H), stays f32 (it seeds the accumulator)

    stream_dtype = jnp.dtype(weight_dtype) if weight_dtype is not None else x.dtype
    if weight_dtype is not None:                   # bf16 weight streaming option
        w1x = w1x.astype(stream_dtype)
        w2 = w2.astype(stream_dtype)
        x = x.astype(stream_dtype)                 # x traffic is tiny; cast once here

    # --- pad batch to a sublane multiple (unmasked stores, better MXU M-utilization)
    B_pad = max(8, -(-B // 8) * 8)
    if B_pad != B:
        x = jnp.pad(x, ((0, B_pad - B), (0, 0)))
        hb = jnp.pad(hb, ((0, B_pad - B), (0, 0)))

    w_bytes = stream_dtype.itemsize if hasattr(stream_dtype, "itemsize") else jnp.dtype(stream_dtype).itemsize
    td = d_tile if d_tile is not None else _pick_tile(D, H, w_bytes)
    assert D % td == 0, "d_tile must divide input_dim"
    n_d = D // td

    # ---------------- phase 1: h = ReLU(x @ W1x + hb) ----------------
    h = pl.pallas_call(
        _phase1_kernel,
        out_shape=jax.ShapeDtypeStruct((B_pad, H), stream_dtype),
        grid_spec=pltpu.PrefetchScalarGridSpec(
            num_scalar_prefetch=0,
            grid=(n_d,),
            in_specs=[
                pl.BlockSpec((B_pad, td), lambda k: (0, k)),   # x k-tile
                pl.BlockSpec((td, H), lambda k: (k, 0)),       # W1x k-tile (streamed)
                pl.BlockSpec((B_pad, H), lambda k: (0, 0)),    # gathered class bias (resident)
            ],
            out_specs=pl.BlockSpec((B_pad, H), lambda k: (0, 0)),      # resident, written at last k
            scratch_shapes=[pltpu.VMEM((B_pad, H), jnp.float32)],      # f32 accumulator
        ),
        compiler_params=pltpu.CompilerParams(
            dimension_semantics=("arbitrary",),                # reduction axis
            vmem_limit_bytes=32 * 1024 * 1024,
        ),
        cost_estimate=pl.CostEstimate(
            flops=2 * B_pad * D * H,
            transcendentals=0,
            bytes_accessed=B_pad * D * w_bytes + D * H * w_bytes + 2 * B_pad * H * 4,
        ),
    )(x, w1x, hb)

    # ---------------- phase 2: y = h @ W2 + b2 ----------------
    y = pl.pallas_call(
        _phase2_kernel,
        out_shape=jax.ShapeDtypeStruct((B_pad, D), out_dtype),
        grid_spec=pltpu.PrefetchScalarGridSpec(
            num_scalar_prefetch=0,
            grid=(n_d,),
            in_specs=[
                pl.BlockSpec((B_pad, H), lambda j: (0, 0)),    # h (resident)
                pl.BlockSpec((H, td), lambda j: (0, j)),       # W2 column tile (streamed)
                pl.BlockSpec((1, td), lambda j: (0, j)),       # b2 tile rides same index map
            ],
            out_specs=pl.BlockSpec((B_pad, td), lambda j: (0, j)),  # lane-dense output tile
        ),
        compiler_params=pltpu.CompilerParams(
            dimension_semantics=("parallel",),                 # output tiles shard across TCs (v7x)
            vmem_limit_bytes=32 * 1024 * 1024,
        ),
        cost_estimate=pl.CostEstimate(
            flops=2 * B_pad * H * D,
            transcendentals=0,
            bytes_accessed=B_pad * H * w_bytes + H * D * w_bytes + D * 4 + B_pad * D * 4,
        ),
    )(h, w2, b2.reshape(1, D))

    return y[:B]


# ---------------------------------------------------------------------------
# Init / reference
# ---------------------------------------------------------------------------

def init_params(key, input_dim, num_classes, hidden):
    """Deterministic init mimicking PyTorch defaults (Embedding ~ N(0,1), Linear ~ U(+/-1/sqrt(fan_in)))."""
    k_emb, k_w1, k_b1, k_w2, k_b2 = jax.random.split(key, 5)
    fan1 = input_dim + num_classes
    fan2 = hidden
    return {
        "emb": jax.random.normal(k_emb, (num_classes, num_classes), jnp.float32),
        "w1": jax.random.uniform(k_w1, (fan1, hidden), jnp.float32,
                                 -1.0 / jnp.sqrt(fan1), 1.0 / jnp.sqrt(fan1)),
        "b1": jax.random.uniform(k_b1, (hidden,), jnp.float32,
                                 -1.0 / jnp.sqrt(fan1), 1.0 / jnp.sqrt(fan1)),
        "w2": jax.random.uniform(k_w2, (hidden, input_dim), jnp.float32,
                                 -1.0 / jnp.sqrt(fan2), 1.0 / jnp.sqrt(fan2)),
        "b2": jax.random.uniform(k_b2, (input_dim,), jnp.float32,
                                 -1.0 / jnp.sqrt(fan2), 1.0 / jnp.sqrt(fan2)),
    }


def reference_forward(x, labels, params):
    """Pure-JAX reference mirroring the PyTorch forward exactly."""
    c = params["emb"][labels]
    xc = jnp.concatenate([x, c], axis=1)
    h = jnp.maximum(xc @ params["w1"] + params["b1"], 0.0)
    return h @ params["w2"] + params["b2"]


if __name__ == "__main__":
    # Small shapes consistent with the module structure:
    # FEAT_DIM (128*125*1=16000) scaled down to 256; hidden 512 scaled to 128; 7 classes kept.
    B, INPUT_DIM, NUM_CLASSES, HIDDEN = 4, 256, 7, 128

    key = jax.random.PRNGKey(0)
    k_params, k_x, k_lbl = jax.random.split(key, 3)

    params = init_params(k_params, INPUT_DIM, NUM_CLASSES, HIDDEN)
    x = jax.random.normal(k_x, (B, INPUT_DIM), jnp.float32)
    labels = jax.random.randint(k_lbl, (B,), 0, NUM_CLASSES)

    ref = reference_forward(x, labels, params)

    # f32 weight streaming; d_tile=128 exercises a 2-step grid in each phase.
    out = conditional_generator(x, labels, params, d_tile=128)
    out = jax.block_until_ready(out)
    assert out.shape == (B, INPUT_DIM)
    assert jnp.allclose(out, ref, atol=1e-4, rtol=1e-4), "f32 mismatch vs pure-JAX reference"

    # bf16 weight streaming (halves HBM weight traffic); accumulation stays f32.
    out_bf16 = conditional_generator(x, labels, params,
                                     weight_dtype=jnp.bfloat16, d_tile=128)
    out_bf16 = jax.block_until_ready(out_bf16)
    assert jnp.allclose(out_bf16, ref, atol=5e-2, rtol=5e-2), "bf16 mismatch vs reference"

    print("KERNEL_OK")
</pallas_src>

<mosaic_0001>
module attributes {stable_mosaic.version = 11 : i64} {
  func.func @_phase1_kernel(%arg0: i32, %arg1: memref<8x128xf32, #tpu.memory_space<vmem>>, %arg2: memref<128x128xf32, #tpu.memory_space<vmem>>, %arg3: memref<8x128xf32, #tpu.memory_space<vmem>>, %arg4: memref<8x128xf32, #tpu.memory_space<vmem>>, %arg5: memref<8x128xf32, #tpu.memory_space<vmem>>) attributes {dimension_semantics = [#tpu.dimension_semantics<arbitrary>], iteration_bounds = array<i64: 2>, scalar_prefetch = 0 : i64, scratch_operands = 1 : i64, tpu.core_type = #tpu.core_type<tc>, window_params = [{transform_indices = @transform_0, window_bounds = array<i64: 8, 128>}, {transform_indices = @transform_1, window_bounds = array<i64: 128, 128>}, {pipeline_mode = #tpu.pipeline_mode<synchronous>, transform_indices = @transform_2, window_bounds = array<i64: 8, 128>}, {pipeline_mode = #tpu.pipeline_mode<synchronous>, transform_indices = @transform_3, window_bounds = array<i64: 8, 128>}]} {
    %c0_i32 = arith.constant 0 : i32
    %0 = arith.cmpi eq, %arg0, %c0_i32 : i32
    %1 = arith.extui %0 : i1 to i32
    %c0_i32_0 = arith.constant 0 : i32
    %2 = arith.cmpi ne, %1, %c0_i32_0 : i32
    scf.if %2 {
      %c0_9 = arith.constant 0 : index
      %c0_10 = arith.constant 0 : index
      %12 = vector.load %arg3[%c0_9, %c0_10] : memref<8x128xf32, #tpu.memory_space<vmem>>, vector<8x128xf32>
      %c0_11 = arith.constant 0 : index
      %c0_12 = arith.constant 0 : index
      %13 = vector.load %arg5[%c0_11, %c0_12] : memref<8x128xf32, #tpu.memory_space<vmem>>, vector<8x128xf32>
      tpu.vector_store %arg5[%c0_11, %c0_12], %12 {strides = array<i32>} : memref<8x128xf32, #tpu.memory_space<vmem>>, vector<8x128xf32>,
    } else {
    }
    %c0 = arith.constant 0 : index
    %c0_1 = arith.constant 0 : index
    %3 = vector.load %arg2[%c0, %c0_1] : memref<128x128xf32, #tpu.memory_space<vmem>>, vector<128x128xf32>
    %c0_2 = arith.constant 0 : index
    %c0_3 = arith.constant 0 : index
    %4 = vector.load %arg5[%c0_2, %c0_3] : memref<8x128xf32, #tpu.memory_space<vmem>>, vector<8x128xf32>
    %c0_4 = arith.constant 0 : index
    %c0_5 = arith.constant 0 : index
    %5 = vector.load %arg1[%c0_4, %c0_5] : memref<8x128xf32, #tpu.memory_space<vmem>>, vector<8x128xf32>
    %cst = arith.constant dense<0.000000e+00> : vector<8x128xf32>
    %6 = tpu.matmul %5, %3, %cst {dimension_numbers = #tpu.dot_dimension_numbers<[1], [0], [0], [1], [0, 0, 1, 1], [], []>} : vector<8x128xf32>, vector<128x128xf32>, vector<8x128xf32> -> vector<8x128xf32>
    %7 = arith.addf %4, %6 : vector<8x128xf32>
    %c0_6 = arith.constant 0 : index
    %c0_7 = arith.constant 0 : index
    %8 = vector.load %arg5[%c0_6, %c0_7] : memref<8x128xf32, #tpu.memory_space<vmem>>, vector<8x128xf32>
    tpu.vector_store %arg5[%c0_6, %c0_7], %7 {strides = array<i32>} : memref<8x128xf32, #tpu.memory_space<vmem>>, vector<8x128xf32>,
    %c1_i32 = arith.constant 1 : i32
    %9 = arith.cmpi eq, %arg0, %c1_i32 : i32
    %10 = arith.extui %9 : i1 to i32
    %c0_i32_8 = arith.constant 0 : i32
    %11 = arith.cmpi ne, %10, %c0_i32_8 : i32
    scf.if %11 {
      %c0_9 = arith.constant 0 : index
      %c0_10 = arith.constant 0 : index
      %12 = vector.load %arg5[%c0_9, %c0_10] : memref<8x128xf32, #tpu.memory_space<vmem>>, vector<8x128xf32>
      %cst_11 = arith.constant 0.000000e+00 : f32
      %13 = vector.broadcast %cst_11 : f32 to vector<8x128xf32>
      %14 = arith.maximumf %12, %13 : vector<8x128xf32>
      %c0_12 = arith.constant 0 : index
      %c0_13 = arith.constant 0 : index
      %15 = vector.load %arg4[%c0_12, %c0_13] : memref<8x128xf32, #tpu.memory_space<vmem>>, vector<8x128xf32>
      tpu.vector_store %arg4[%c0_12, %c0_13], %14 {strides = array<i32>} : memref<8x128xf32, #tpu.memory_space<vmem>>, vector<8x128xf32>,
    } else {
    }
    return
  }
  func.func @transform_0(%arg0: i32) -> (i32, i32) {
    %c0_i32 = arith.constant 0 : i32
    %c0_i32_0 = arith.constant 0 : i32
    return %c0_i32, %arg0 : i32, i32
  }
  func.func @transform_1(%arg0: i32) -> (i32, i32) {
    %c0_i32 = arith.constant 0 : i32
    %c0_i32_0 = arith.constant 0 : i32
    return %arg0, %c0_i32 : i32, i32
  }
  func.func @transform_2(%arg0: i32) -> (i32, i32) {
    %c0_i32 = arith.constant 0 : i32
    %c0_i32_0 = arith.constant 0 : i32
    %c0_i32_1 = arith.constant 0 : i32
    return %c0_i32, %c0_i32_0 : i32, i32
  }
  func.func @transform_3(%arg0: i32) -> (i32, i32) {
    %c0_i32 = arith.constant 0 : i32
    %c0_i32_0 = arith.constant 0 : i32
    %c0_i32_1 = arith.constant 0 : i32
    return %c0_i32, %c0_i32_0 : i32, i32
  }
}

</mosaic_0001>

<bundles_post_ra>
// kernel: tpu_custom_call.1
= control target key start
LH: loop header
LB: loop body
LE: loop exit
PB: predicated region body
PF: predicated region fallthrough
CT: control target
= control target key end

     0   :  { %8 = vsyncpa [#allocation4], 0  ;;  %s1015_s0 = inlined_call_operand.hbm [shape: f32[8,256], index: 0, kind: input, shape index: {}]   ;;  %s1016_s1 = inlined_call_operand.hbm [shape: f32[256,128], index: 1, kind: input, shape index: {}]   ;;  %s1017_s2 = inlined_call_operand.hbm [shape: f32[8,128], index: 2, kind: input, shape index: {}]   ;;  %s1018_s3 = inlined_call_operand.hbm [shape: f32[8,128], index: 3, kind: output, shape index: {}]  }
   0x1   :  { %10 = vsyncpa [#allocation4 + $0x1], 0 }
   0x2   :  { %11 = vsyncpa [#allocation7], 0 }
   0x3   :  { %13 = vsyncpa [#allocation7 + $0x1], 0 }
   0x4   :  { %14 = vsyncpa [#allocation5], 0  ;;  %s773_s12 = smov 0   ;;  %s775_s13 = smov 0  }
   0x5   :  { %s777_s14 = smov 0   ;;  %s779_s15 = smov 0  }
   0x6 LB: > { %s792_s16 = sadd.s32 4294967295, %s742_s15   ;;  %s795_s17 = sadd.s32 1, %s742_s15   ;;  %s742_s15 = sphi %s779_s15, %s1037_s15   ;;  %s738_s14 = sphi %s777_s14, %s1036_s14   ;;  %s734_s13 = sphi %s775_s13, %s1035_s13   ;;  %s730_s12 = sphi %s773_s12, %s1034_s12  }
   0x7   : > { %s24_s18 = ssub.s32 %s742_s15, %s795_s17  ;;  %s27_s19 = sadd.s32 1, %s738_s14 }
   0x8   : > { %p25_p0 = scmp.eq.s32.totalorder %s24_s18, 0  ;;  %p34_p1 = scmp.ne.s32.totalorder %s738_s14, %s734_s13 }
   0x9   : > { %p40_p2 = scmp.ne.s32.totalorder %s734_s13, %s730_s12  ;;  %p1019_p3 = scmp.eq.s32.totalorder %s792_s16, 0 }
   0xa   : > { %s805_s20 = scalar_select %p25_p0, %s738_s14, %s27_s19  }
   0xb   : > { %p809_p4 = por %p1019_p3, %p40_p2  ;;  %p420_p5 = scmp.ge.s32.totalorder %s742_s15, 1 }
   0xc   : > { %p119_p6 = scmp.lt.s32.totalorder %s742_s15, 3  ;;  %s744_s23 = smov [#allocation8]  }
   0xd   : > { %s1022_s21 = scalar_select %p809_p4, 1, 0 }
   0xe   : > { %p816_p8 = pnand %p420_p5, %p119_p6  ;;  %s132_s24 = sshll.u32 %s744_s23, 4  ;;  %s133_s24 = int_to_ptr.vmem [resolvable:$true] %s132_s24 }
   0xf   : > { %p35_p9 = scmp.eq.s32.totalorder %s742_s15, 0  ;;  %s832_s26 = sand.u32 1, %s738_s14  }
  0x10   : > { %s1023_s22 = scalar_select %p816_p8, 1, 0 }
  0x11   : > { %p527_p10 = pneg %p816_p8  ;;  %p827_p12 = por %p35_p9, %p34_p1 }
  0x12   : > { %s423_s28 = sshll.u32 %s832_s26, 3  ;;  %s424_s29 = sshll.u32 %s742_s15, 7 }
  0x13   : > { %s1024_s25 = scalar_select %p827_p12, 1, 0 }
  0x14   : > { %p836_p13 = pnand %p527_p10, %p1019_p3  ;;  %s582_s5 = scalar_lea.hbm %s1017_s2, 128 }
  0x15   : > { %p583_p0 = scmp.ne.s32.totalorder %s1017_s2, %s582_s5  ;;  %p589_p6 = scmp.lt.u32.totalorder %s582_s5, %s1017_s2 }
  0x16   : > { %p584_p1 = pneg %p836_p13 }
  0x18   : > { %p585_p2 = pnand %p584_p1, %p583_p0 }
  0x1a   : > { %p586_p5 = pneg %p585_p2 }
  0x1c   : > { %p591_p9 = pnand %p589_p6, %p586_p5 }
  0x1e   : > { %594 = shalt.err (!%p591_p9)
}
  0x1f   : > { %s595_s10 = scalar_lea.vmem %s133_s24, 128  ;;  %p603_p11 = scmp.lt.s32.totalorder %s133_s24, %s133_s24 }
  0x20   : > { %p596_p10 = scmp.ne.s32.totalorder %s133_s24, %s595_s10  ;;  %p604_p4 = scmp.lt.s32.totalorder %s595_s10, %s595_s10 }
  0x22   : > { %p598_p7 = pnand %p596_p10, %p584_p1  ;;  %p605_p8 = por %p604_p4, %p603_p11 }
  0x24   : > { %p599_p3 = pneg %p598_p7 }
  0x26   : > { %p606_p12 = pnand %p605_p8, %p599_p3 }
  0x28   : > { %609 = shalt.err (!%p606_p12)
}
  0x29   : > { %530 = dma.hbm_to_vmem [thread:$0]  (!%p836_p13), %s1017_s2, 128, %s133_s24, [#allocation7]  }
  0x2a   : > { %s861_s23 = scalar_lea.hbm %s1015_s0, %s424_s29  ;;  %s147_s30 = scalar_lea.vmem [#allocation3], %s423_s28 }
  0x2b   : > { %s154_s27 = sshll.u32 %s147_s30, 4  ;;  %p1026_p3 = scmp.ne.s32.totalorder %s1024_s25, 0  ;;  %s863_s27 = int_to_ptr.vmem [resolvable:$true] %s154_s27 }
  0x2c   : > { %p1027_p4 = scmp.lt.s32.totalorder %s742_s15, 2  ;;  %s425_s24 = sshll.u32 %s832_s26, 7 }
  0x2d   : > { %s161_s5 = sand.u32 1, %s742_s15   ;;  %s144_s29 = scalar_lea.sflag [#allocation4], %s832_s26 }
  0x2e   : > { %p869_p7 = pnand %p1027_p4, %p1026_p3  ;;  %s610_s6 = scalar_lea.hbm %s861_s23, 128 }
  0x2f   : > { %p611_p8 = scmp.ne.s32.totalorder %s861_s23, %s610_s6  ;;  %s615_s7 = scalar_lea.hbm %s1015_s0, 256 }
  0x30   : > { %p612_p11 = pneg %p869_p7  ;;  %p616_p0 = scmp.lt.u32.totalorder %s861_s23, %s1015_s0 }
  0x31   : > { %p617_p1 = scmp.lt.u32.totalorder %s615_s7, %s610_s6  ;;  %p619_p5 = scmp.lt.u32.totalorder %s610_s6, %s861_s23 }
  0x32   : > { %p613_p12 = pnand %p612_p11, %p611_p8 }
  0x33   : > { %p618_p2 = por %p617_p1, %p616_p0 }
  0x34   : > { %p614_p13 = pneg %p613_p12 }
  0x35   : > { %p620_p6 = por %p619_p5, %p618_p2 }
  0x37   : > { %p621_p9 = pnand %p620_p6, %p614_p13 }
  0x39   : > { %624 = shalt.err (!%p621_p9)
}
  0x3a   : > { %s625_s10 = scalar_lea.vmem %s863_s27, 128  ;;  %s745_s11 = smov [#allocation3]  }
  0x3b   : > { %p626_p10 = scmp.ne.s32.totalorder %s863_s27, %s625_s10  ;;  %s630_s12 = sshll.u32 %s745_s11, 4  ;;  %s631_s12 = int_to_ptr.vmem [resolvable:$false] %s630_s12 }
  0x3c   : > { %s632_s18 = scalar_lea.vmem %s631_s12, 256  ;;  %p633_p8 = scmp.lt.s32.totalorder %s863_s27, %s631_s12 }
  0x3d   : > { %p628_p3 = pnand %p626_p10, %p612_p11  ;;  %p634_p12 = scmp.lt.s32.totalorder %s632_s18, %s625_s10 }
  0x3f   : > { %p629_p4 = pneg %p628_p3  ;;  %p635_p0 = por %p634_p12, %p633_p8 }
  0x41   : > { %p636_p1 = pnand %p635_p0, %p629_p4 }
  0x43   : > { %639 = shalt.err (!%p636_p1)
}
  0x44   : > { %534 = dma.hbm_to_vmem [thread:$0]  (!%p869_p7), %s861_s23, 128, %s863_s27, %s144_s29  }
  0x45   : > { %s165_s19 = scalar_lea.vmem [#allocation6], %s425_s24  ;;  %s438_s6 = sshll.u32 %s742_s15, 11 }
  0x46   : > { %s172_s30 = sshll.u32 %s165_s19, 4  ;;  %s909_s7 = scalar_lea.hbm %s1016_s1, %s438_s6  ;;  %s903_s30 = int_to_ptr.vmem [resolvable:$true] %s172_s30 }
  0x47   : > { %s913_s8 = scalar_lea.sflag [#allocation7], %s161_s5  ;;  %s640_s9 = scalar_lea.hbm %s909_s7, 2048 }
  0x48   : > { %p641_p13 = scmp.ne.s32.totalorder %s909_s7, %s640_s9  ;;  %s645_s27 = scalar_lea.hbm %s1016_s1, 4096 }
  0x49   : > { %p646_p6 = scmp.lt.u32.totalorder %s909_s7, %s1016_s1  ;;  %p647_p9 = scmp.lt.u32.totalorder %s645_s27, %s640_s9 }
  0x4a   : > { %p643_p2 = pnand %p641_p13, %p612_p11  ;;  %p649_p3 = scmp.lt.u32.totalorder %s640_s9, %s909_s7 }
  0x4b   : > { %p648_p10 = por %p647_p9, %p646_p6 }
  0x4c   : > { %p644_p5 = pneg %p643_p2 }
  0x4d   : > { %p650_p4 = por %p649_p3, %p648_p10 }
  0x4f   : > { %p651_p8 = pnand %p650_p4, %p644_p5 }
  0x51   : > { %654 = shalt.err (!%p651_p8)
}
  0x52   : > { %s655_s15 = scalar_lea.vmem %s903_s30, 2048  ;;  %s746_s5 = smov [#allocation6]  }
  0x53   : > { %p656_p12 = scmp.ne.s32.totalorder %s903_s30, %s655_s15  ;;  %s660_s10 = sshll.u32 %s746_s5, 4  ;;  %s661_s10 = int_to_ptr.vmem [resolvable:$false] %s660_s10 }
  0x54   : > { %s662_s11 = scalar_lea.vmem %s661_s10, 4096  ;;  %p663_p13 = scmp.lt.s32.totalorder %s903_s30, %s661_s10 }
  0x55   : > { %p658_p0 = pnand %p656_p12, %p612_p11  ;;  %p664_p2 = scmp.lt.s32.totalorder %s662_s11, %s655_s15 }
  0x57   : > { %p659_p1 = pneg %p658_p0  ;;  %p665_p6 = por %p664_p2, %p663_p13 }
  0x59   : > { %p666_p9 = pnand %p665_p6, %p659_p1 }
  0x5b   : > { %669 = shalt.err (!%p666_p9)
}
  0x5c   : > { %s747_s12 = smov 128   ;;  %s748_s18 = smov 8  }
  0x5d   : > { %537 = dma.hbm_to_vmem [thread:$0]  (!%p869_p7), %s909_s7, 2048, %s903_s30, %s913_s8, %s747_s12, %s747_s12, %s748_s18  }
  0x5e   : > { %p1029_p11 = scmp.ne.s32.totalorder %s1023_s22, 0 }
  0x5f   : > { %s186_s19 = sand.u32 (!%p1029_p11), 1, %s734_s13   ;;  %p1030_p5 = scmp.ne.s32.totalorder (!%p1029_p11), %s1022_s21, 0 }
  0x60   : > { %184 = sbr.rel (%p1029_p11) target bundleno = 403 (0x193), region = 32  ;;  %s429_s6 = sshll.u32 (!%p1029_p11), %s186_s19, 3 }
  0x61   : > { %s187_s28 = scalar_lea.sflag (!%p1029_p11), [#allocation4], %s186_s19  ;;  %s942_s25 = scalar_lea.vmem (!%p1029_p11), [#allocation3], %s429_s6 }
  0x67   : > { %713 = dma.done.wait (%p1030_p5), %s187_s28, 128  }
  0x68   : > { %715 = vsyncadd (%p1030_p5), %s187_s28, 4294967168  ;;  %s195_s9 = sand.u32 1, %s792_s16   ;;  %s430_s4 = sshll.u32 %s186_s19, 7 }
  0x69   : > { %s196_s30 = scalar_lea.sflag [#allocation7], %s195_s9  ;;  %s949_s7 = scalar_lea.vmem [#allocation6], %s430_s4 }
  0x6a   : > { %717 = dma.done.wait (%p1030_p5), %s196_s30, 2048  }
  0x6b   : > { %719 = vsyncadd (%p1030_p5), %s196_s30, 4294965248  ;;  %p1031_p7 = scmp.eq.s32.totalorder %s792_s16, 0 }
  0x6d   : > { %721 = dma.done.wait (%p1031_p7), [#allocation7], 128   ;;  %p1032_p10 = pmov %p1031_p7 }
  0x6e   : > { %p1033_p3 = scmp.ne.s32.totalorder %s792_s16, 0 }
  0x6f   : > { %723 = vsyncadd (%p1032_p10), [#allocation7], 4294967168  ;;  %v231_v0 = vld [vmem:[#allocation8] sm:$0xff] (!%p1033_p3) }
  0x70   : > { %230 = sbr.rel (%p1033_p3) target bundleno = 119 (0x77), region = 48  ;;  %232 = vst [vmem:[#allocation2] sm:$0xff] (!%p1033_p3), %v231_v0 }
  0x77 PF: > { %v233_v1 = vld [vmem:[%s949_s7] sm:$0xff]  ;;  %v234_v2 = vld [vmem:[%s949_s7 + $0x8] sm:$0xff]  ;;  %v235_v3 = vld [vmem:[%s949_s7 + $0x10] sm:$0xff]  ;;  %v749_v4 = vmov 0.0|0.0   ;;  %vm750_vm0 = vmmov 0   ;;  %v751_v7 = vmov 0.0  }
  0x78   : > { %491 = vmatprep.subr.bf16.mxu0 %v749_v4  ;;  %v492_v5 = vpack.c.bf16 %v234_v2, %v233_v1  ;;  %v236_v6 = vld [vmem:[%s949_s7 + $0x18] sm:$0xff]  ;;  %488 = vmatprep.mubr.msk.f32.mxu0 %vm750_vm0, %v751_v7  ;;  %v237_v9 = vld [vmem:[%s949_s7 + $0x20] sm:$0xff]  ;;  %v238_v10 = vld [vmem:[%s949_s7 + $0x28] sm:$0xff]  ;;  %p433_p4 = scmp.ne.s32.totalorder %s792_s16, 1 }
  0x79   : > { %v495_v8 = vpack.c.bf16 %v236_v6, %v235_v3  ;;  %v498_v11 = vpack.c.bf16 %v238_v10, %v237_v9  ;;  %v239_v12 = vld [vmem:[%s949_s7 + $0x30] sm:$0xff]  ;;  %v240_v13 = vld [vmem:[%s949_s7 + $0x38] sm:$0xff]  ;;  %v241_v15 = vld [vmem:[%s949_s7 + $0x40] sm:$0xff] }
  0x7a   : > { %493 = vmatpush3.bf16.msra.mxu0 %v492_v5  ;;  %v501_v14 = vpack.c.bf16 %v240_v13, %v239_v12  ;;  %v242_v16 = vld [vmem:[%s949_s7 + $0x48] sm:$0xff]  ;;  %v243_v18 = vld [vmem:[%s949_s7 + $0x50] sm:$0xff]  ;;  %v244_v19 = vld [vmem:[%s949_s7 + $0x58] sm:$0xff] }
  0x7b   : > { %494 = vmatprep.subr.bf16.mxu0 %v749_v4  ;;  %v504_v17 = vpack.c.bf16 %v242_v16, %v241_v15  ;;  %v507_v20 = vpack.c.bf16 %v244_v19, %v243_v18  ;;  %v245_v21 = vld [vmem:[%s949_s7 + $0x60] sm:$0xff]  ;;  %v246_v22 = vld [vmem:[%s949_s7 + $0x68] sm:$0xff]  ;;  %v247_v24 = vld [vmem:[%s949_s7 + $0x70] sm:$0xff] }
  0x7c   : > { %v510_v23 = vpack.c.bf16 %v246_v22, %v245_v21  ;;  %v248_v25 = vld [vmem:[%s949_s7 + $0x78] sm:$0xff]  ;;  %v249_v28 = vld [vmem:[#allocation2] sm:$0xff] }
  0x7d   : > { %v513_v26 = vpack.c.bf16 %v248_v25, %v247_v24  ;;  %v250_v27 = vld [vmem:[%s942_s25] sm:$0xff] }
  0x7e   : > { %496 = vmatpush3.bf16.msra.mxu0 %v495_v8 }
  0x7f   : > { %497 = vmatprep.subr.bf16.mxu0 %v749_v4 }
  0x82   : > { %499 = vmatpush3.bf16.msra.mxu0 %v498_v11 }
  0x83   : > { %500 = vmatprep.subr.bf16.mxu0 %v749_v4 }
  0x86   : > { %502 = vmatpush3.bf16.msra.mxu0 %v501_v14 }
  0x87   : > { %503 = vmatprep.subr.bf16.mxu0 %v749_v4 }
  0x8a   : > { %505 = vmatpush3.bf16.msra.mxu0 %v504_v17 }
  0x8b   : > { %506 = vmatprep.subr.bf16.mxu0 %v749_v4 }
  0x8e   : > { %508 = vmatpush3.bf16.msra.mxu0 %v507_v20 }
  0x8f   : > { %509 = vmatprep.subr.bf16.mxu0 %v749_v4 }
  0x92   : > { %511 = vmatpush3.bf16.msra.mxu0 %v510_v23 }
  0x93   : > { %512 = vmatprep.subr.bf16.mxu0 %v749_v4 }
  0x96   : > { %514 = vmatpush3.bf16.msra.mxu0 %v513_v26 }
  0x99   : > { %489 = vmatmul.mubr.f32.vlgmr.msra.gmra.mrb[0].mxu0 %v250_v27 }
 0x169   : > { %326 = sbr.rel (%p433_p4) target bundleno = 378 (0x17a), region = 52 }
 0x16c   : > { %v317_v29 = vpop.f32.mrb[0].mxu0 }
 0x16d   : > { %v321_v30 = vadd.f32 %v317_v29, %v249_v28  ;;  %v490_v31 = vpop.f32.mrb[1].mxu0 }
 0x16f   : > { %322 = vst [vmem:[#allocation2] sm:$0xff] %v321_v30 }
 0x176   : > { %v327_v32 = vld [vmem:[#allocation2] sm:$0xff] }
 0x177   : > { %v328_v33 = vmax.f32 %v327_v32, 0.0 }
 0x179   : > { %329 = vst [vmem:[#allocation9] sm:$0xff] %v328_v33 }
 0x17a PF: > { %p541_p8 = scmp.eq.s32.totalorder %s792_s16, 1  ;;  %s752_s21 = smov [#allocation9]  }
 0x17b   : > { %s337_s22 = sshll.u32 %s752_s21, 4  ;;  %s338_s22 = int_to_ptr.vmem [resolvable:$true] %s337_s22 }
 0x17c   : > { %s670_s8 = scalar_lea.vmem %s338_s22, 128  ;;  %p677_p13 = scmp.lt.s32.totalorder %s338_s22, %s338_s22 }
 0x17d   : > { %p671_p12 = scmp.ne.s32.totalorder %s338_s22, %s670_s8  ;;  %p678_p2 = scmp.lt.s32.totalorder %s670_s8, %s670_s8 }
 0x17f   : > { %p672_p0 = pnand %p671_p12, %p541_p8  ;;  %p679_p6 = por %p678_p2, %p677_p13 }
 0x181   : > { %p673_p1 = pneg %p672_p0 }
 0x183   : > { %p680_p9 = pnand %p679_p6, %p673_p1 }
 0x185   : > { %683 = shalt.err (!%p680_p9)
}
 0x186   : > { %s684_s27 = scalar_lea.hbm %s1018_s3, 128 }
 0x187   : > { %p685_p11 = scmp.ne.s32.totalorder %s1018_s3, %s684_s27  ;;  %p690_p10 = scmp.lt.u32.totalorder %s684_s27, %s1018_s3 }
 0x189   : > { %p686_p5 = pnand %p685_p11, %p541_p8 }
 0x18b   : > { %p687_p7 = pneg %p686_p5 }
 0x18d   : > { %p692_p3 = pnand %p690_p10, %p687_p7 }
 0x18f   : > { %695 = shalt.err (!%p692_p3)
}
 0x190   : > { %524 = dma.vmem_to_hbm [thread:$0]  (%p541_p8), %s338_s22, 128, %s1018_s3, [#allocation5]  }
 0x191   : > { %725 = dma.done.wait (%p541_p8), [#allocation5], 128  }
 0x192   : > { %727 = vsyncadd (%p541_p8), [#allocation5], 4294967168 }
 0x193 PF: > { %p17_p4 = scmp.ge.s32.totalorder %s795_s17, 4   ;;  %s1034_s12 = smov %s734_s13 }
 0x194   : > { %s1035_s13 = smov %s738_s14  ;;  %s1036_s14 = smov %s805_s20 }
 0x195   : > { %s1037_s15 = smov %s795_s17  ;;  %19 = sbr.rel (!%p17_p4) target bundleno = 6 (0x6), region = 94 }
 0x19c   :  { %350 = vsyncpa [#allocation4], 1 }
 0x19d   :  { %352 = vsyncpa [#allocation4 + $0x1], 1 }
 0x19e   :  { %353 = vsyncpa [#allocation7], 1 }
 0x19f   :  { %355 = vsyncpa [#allocation7 + $0x1], 1 }
 0x1a0   :  { %356 = vsyncpa [#allocation5], 1 }
 0x1a1   :  { %358 = vsyncpa [#allocation5 + $0x1], 1 }

</bundles_post_ra>
